<compile_context>
chip_gen: v6e
topology: v6e:2x2x1
jax: 0.10.0
libtpu: 0.0.40
codegen_flags: <defaults>
</compile_context>

<pallas_src>
import functools

import numpy as np
import jax
import jax.numpy as jnp
from jax.experimental import pallas as pl
from jax.experimental.pallas import tpu as pltpu


# ----------------------------------------------------------------------------
# Kernels
# ----------------------------------------------------------------------------
def _soft_pool_fused_kernel(x_ref, p_ref, o_ref, *, mxu_bf16):
    """Small-image path: H and W pooling fused into one banded matmul.

    x_ref: (bt, C, H*W)   p_ref: (H*W, Ho*Wo)   o_ref: (bt, C, Ho*Wo)
    """
    x = x_ref[...].astype(jnp.float32)                      # (bt, C, HW)
    bt = x.shape[0]
    # Channel-softmax weights (sublane reduction + sublane broadcast).
    e_x = jnp.sum(jnp.exp(x), axis=1, keepdims=True)        # (bt, 1, HW)
    num = x * e_x                                            # (bt, C, HW)
    p = p_ref[...]                                           # (HW, HoWo)
    if mxu_bf16:
        num = num.astype(jnp.bfloat16)
        e_x = e_x.astype(jnp.bfloat16)
        p = p.astype(jnp.bfloat16)
    # Per-batch-element 2-D dots using leading-dim indexing only: this avoids
    # the sublane-unaligned reshape/concat that a single (bt*(C+1), HW) LHS
    # would require.  In this small-image regime the MXU has huge headroom,
    # so the small M per dot is irrelevant, while the (C, Ho*Wo) results keep
    # the output stores lane-dense (the big store-bandwidth lever vs. storing
    # with lane extent Wo).  bt is capped small in the wrapper so the static
    # unroll stays cheap.
    for b in range(bt):
        num_p = jnp.dot(num[b], p, preferred_element_type=jnp.float32)  # (C, HoWo)
        den_p = jnp.dot(e_x[b], p, preferred_element_type=jnp.float32)  # (1, HoWo)
        inv = pl.reciprocal(den_p, approx=True)              # EUP rcp
        inv = inv * (2.0 - den_p * inv)                      # one Newton-Raphson step
        o_ref[b] = (num_p * inv).astype(o_ref.dtype)


def _soft_pool_sep_kernel(x_ref, pw_ref, o_ref, *, kh, stride, h_out, mxu_bf16):
    """Large-image path: W pooling on the MXU, H pooling via XLU sublane rolls.

    x_ref: (bt, C, H, W)   pw_ref: (W, Wo)   o_ref: (bt, C, Ho, Wo)
    """
    x = x_ref[...].astype(jnp.float32)                       # (bt, C, H, W)
    bt, c, h, w = x.shape
    w_out = pw_ref.shape[1]

    e_x = jnp.sum(jnp.exp(x), axis=1, keepdims=True)         # (bt, 1, H, W)
    num = x * e_x                                            # (bt, C, H, W)
    # Fuse the denominator into the same W-pool matmul as a (C+1)-th channel
    # (axis 1 is not a minor dim, so this concat is just stacking tile planes).
    lhs = jnp.concatenate([num, e_x], axis=1)                # (bt, C+1, H, W)
    lhs2 = lhs.reshape(bt * (c + 1) * h, w)
    p = pw_ref[...]
    if mxu_bf16:
        lhs2 = lhs2.astype(jnp.bfloat16)
        p = p.astype(jnp.bfloat16)
    wsum = jnp.dot(lhs2, p, preferred_element_type=jnp.float32)
    wsum = wsum.reshape(bt, c + 1, h, w_out)                 # (bt, C+1, H, Wo)

    # H pooling: acc[j] = sum_{i<kh} wsum[j+i].  Shifted terms come from XLU
    # sublane rolls (otherwise-idle unit, no misaligned sublane slices that
    # would materialize full-slab copies); the accumulator is initialized from
    # the i=0 term instead of a zero fill.
    acc = wsum
    for i in range(1, kh):
        acc = acc + pltpu.roll(wsum, (h - i) % h, axis=2)    # acc[j] += wsum[j+i]
    if stride == 1:
        acc = acc[:, :, :h_out, :]                           # single aligned slice
    else:
        # Single strided sublane slice at the very end (instead of kh of them).
        lim = (h_out - 1) * stride + 1
        acc = jax.lax.slice(acc, (0, 0, 0, 0), (bt, c + 1, lim, w_out),
                            (1, 1, stride, 1))

    num_p = acc[:, :c]                                       # (bt, C, Ho, Wo)
    den_p = acc[:, c:]                                       # (bt, 1, Ho, Wo)
    inv = pl.reciprocal(den_p, approx=True)
    inv = inv * (2.0 - den_p * inv)                          # Newton-Raphson step
    o_ref[...] = (num_p * inv).astype(o_ref.dtype)


# ----------------------------------------------------------------------------
# Wrapper helpers
# ----------------------------------------------------------------------------
def _pool_matrix(size, out_size, k, stride):
    """Static 0/1 banded sum-pooling matrix of shape (size, out_size)."""
    rows = np.arange(size)[:, None]
    cols = np.arange(out_size)[None, :]
    return ((rows >= cols * stride) & (rows < cols * stride + k)
            ).astype(np.float32)


def _vmem_capacity_bytes():
    try:
        cap = int(getattr(pltpu.get_tpu_info(), "vmem_capacity_bytes", 0))
        if cap > 0:
            return cap
    except Exception:
        pass
    return 64 << 20        # conservative fallback (v7x per-TC size)


def _pick_batch_tile(n, per_batch_bytes, budget_bytes, max_bt=None):
    bt = max(1, min(n, budget_bytes // max(per_batch_bytes, 1)))
    if max_bt is not None:
        bt = max(1, min(bt, max_bt))
    # Keep the batch grid axis splittable across 2 TensorCores (v7x megacore);
    # on single-TC v5e/v6e this costs at most one extra ~0.35us grid step.
    if n >= 2:
        bt = min(bt, n // 2)
    target = n // 2 if (n >= 2 and n % 2 == 0) else n
    while target % bt:      # shrink to a divisor (=> grid length even when n is)
        bt -= 1
    return bt


def _per_batch_bytes_fused(c, hw, how, in_b, out_b):
    f32 = 4
    io = 2 * c * hw * in_b + 2 * c * how * out_b            # double-buffered blocks
    body = (3 * c + 3) * hw * f32 + 3 * (c + 1) * how * f32  # x_f32, exp, num, e_x, pooled
    return io + body


def _per_batch_bytes_sep(c, h, w, h_out, w_out, in_b, out_b):
    f32 = 4
    hw = h * w
    io = 2 * c * hw * in_b + 2 * c * h_out * w_out * out_b
    body = ((3 * c + 3) * hw + 3 * (c + 1) * h * w_out
            + 2 * (c + 1) * h_out * w_out) * f32
    return io + body


# ----------------------------------------------------------------------------
# Public entry point
# ----------------------------------------------------------------------------
def soft_pool(x, kernel_size=8, stride=1, batch_tile=None, *,
              force_separable=False, mxu_bf16=False):
    if isinstance(kernel_size, int):
        kernel_size = (kernel_size, kernel_size)
    kh, kw = kernel_size
    n, c, h, w = x.shape
    h_out = (h - kh) // stride + 1
    w_out = (w - kw) // stride + 1
    hw, how = h * w, h_out * w_out
    in_b = jnp.dtype(x.dtype).itemsize
    out_b = in_b

    cap = _vmem_capacity_bytes()
    # ~75% of physical VMEM: ~96 MiB on v5e/v6e (128 MiB), ~48 MiB on v7x (64 MiB).
    vmem_limit = min(cap, max(32 << 20, int(cap * 0.75)))

    # Fused single-matmul pooling only when the banded (H*W, Ho*Wo) matrix and
    # the FLOP blowup (~h_out x) stay small; otherwise the separable path.
    p_hw_bytes = hw * how * 4
    use_fused = (not force_separable) and w_out < 128 and p_hw_bytes <= (2 << 20)

    if use_fused:
        p = jnp.asarray(np.kron(_pool_matrix(h, h_out, kh, stride),
                                _pool_matrix(w, w_out, kw, stride)))   # (H*W, Ho*Wo)
        per_batch = _per_batch_bytes_fused(c, hw, how, in_b, out_b)
        p_bytes = p_hw_bytes
        max_bt = 16          # bound the per-batch static unroll in the kernel
    else:
        p = jnp.asarray(_pool_matrix(w, w_out, kw, stride))            # (W, Wo)
        per_batch = _per_batch_bytes_sep(c, h, w, h_out, w_out, in_b, out_b)
        p_bytes = w * w_out * 4
        max_bt = None

    if batch_tile is None:
        budget = vmem_limit - 2 * p_bytes - (6 << 20)   # P double-buffer + headroom
        batch_tile = _pick_batch_tile(n, per_batch, max(budget, per_batch),
                                      max_bt=max_bt)
    bt = batch_tile
    assert n % bt == 0, "batch_tile must divide the batch size"
    # TODO(synk): shapes whose per-batch working set alone exceeds the VMEM
    # budget (huge C*H*W single images) additionally need H_out/C tiling with
    # halos (two-pass e_x for C tiling); not implemented here.

    cparams = pltpu.CompilerParams(dimension_semantics=("parallel",),
                                   vmem_limit_bytes=vmem_limit)

    if use_fused:
        kernel = functools.partial(_soft_pool_fused_kernel, mxu_bf16=mxu_bf16)
        out = pl.pallas_call(
            kernel,
            out_shape=jax.ShapeDtypeStruct((n, c, how), x.dtype),
            grid=(n // bt,),
            in_specs=[
                pl.BlockSpec((bt, c, hw), lambda b: (b, 0, 0)),
                pl.BlockSpec((hw, how), lambda b: (0, 0)),
            ],
            out_specs=pl.BlockSpec((bt, c, how), lambda b: (b, 0, 0)),
            compiler_params=cparams,
        )(x.reshape(n, c, hw), p)     # wrapper reshapes are free layout plumbing
        return out.reshape(n, c, h_out, w_out)

    kernel = functools.partial(_soft_pool_sep_kernel, kh=kh, stride=stride,
                               h_out=h_out, mxu_bf16=mxu_bf16)
    return pl.pallas_call(
        kernel,
        out_shape=jax.ShapeDtypeStruct((n, c, h_out, w_out), x.dtype),
        grid=(n // bt,),
        in_specs=[
            pl.BlockSpec((bt, c, h, w), lambda b: (b, 0, 0, 0)),
            pl.BlockSpec((w, w_out), lambda b: (0, 0)),
        ],
        out_specs=pl.BlockSpec((bt, c, h_out, w_out), lambda b: (b, 0, 0, 0)),
        compiler_params=cparams,
    )(x, p)


# ----------------------------------------------------------------------------
# Pure-JAX reference mirroring the PyTorch forward exactly
# ----------------------------------------------------------------------------
def _soft_pool_ref(x, kernel_size=8, stride=1):
    if isinstance(kernel_size, int):
        kernel_size = (kernel_size, kernel_size)
    kh, kw = kernel_size
    e_x = jnp.sum(jnp.exp(x), axis=1, keepdims=True)

    def _sum_pool(v):
        return jax.lax.reduce_window(
            v, 0.0, jax.lax.add,
            window_dimensions=(1, 1, kh, kw),
            window_strides=(1, 1, stride, stride),
            padding="VALID")

    num = _sum_pool(x * e_x) / (kh * kw) * (kh + kw)
    den = _sum_pool(e_x) / (kh * kw) * (kh + kw)
    return num / den


if __name__ == "__main__":
    key = jax.random.PRNGKey(0)
    # Small shape consistent with the module: N=2, C=4, H=W=16, kernel=8.
    x = jax.random.normal(key, (2, 4, 16, 16), dtype=jnp.float32)

    # Default config (kernel=8, stride=1) -> fused single-matmul path.
    out = jax.block_until_ready(soft_pool(x, kernel_size=8, stride=1))
    ref = _soft_pool_ref(x, kernel_size=8, stride=1)
    assert out.shape == (2, 4, 9, 9), out.shape
    assert jnp.allclose(out, ref, atol=1e-4, rtol=1e-4), "fused path mismatch"

    # Strided config through the same fused path (stride baked into the matrix).
    out2 = jax.block_until_ready(soft_pool(x, kernel_size=8, stride=2))
    ref2 = _soft_pool_ref(x, kernel_size=8, stride=2)
    assert out2.shape == (2, 4, 5, 5), out2.shape
    assert jnp.allclose(out2, ref2, atol=1e-4, rtol=1e-4), "fused stride-2 mismatch"

    # Separable path (W matmul + sublane-roll H pooling), used for large images.
    out3 = jax.block_until_ready(
        soft_pool(x, kernel_size=8, stride=1, force_separable=True))
    assert out3.shape == (2, 4, 9, 9), out3.shape
    assert jnp.allclose(out3, ref, atol=1e-4, rtol=1e-4), "separable path mismatch"

    print("KERNEL_OK")
</pallas_src>

<mosaic_0001>
module attributes {stable_mosaic.version = 11 : i64} {
  func.func @_soft_pool_fused_kernel(%arg0: i32, %arg1: memref<1x4x256xf32, #tpu.memory_space<vmem>>, %arg2: memref<256x81xf32, #tpu.memory_space<vmem>>, %arg3: memref<1x4x81xf32, #tpu.memory_space<vmem>>) attributes {dimension_semantics = [#tpu.dimension_semantics<parallel>], iteration_bounds = array<i64: 2>, scalar_prefetch = 0 : i64, scratch_operands = 0 : i64, tpu.core_type = #tpu.core_type<tc>, window_params = [{transform_indices = @transform_0, window_bounds = array<i64: 1, 4, 256>}, {pipeline_mode = #tpu.pipeline_mode<synchronous>, transform_indices = @transform_1, window_bounds = array<i64: 256, 81>}, {transform_indices = @transform_2, window_bounds = array<i64: 1, 4, 81>}]} {
    %c0 = arith.constant 0 : index
    %c0_0 = arith.constant 0 : index
    %c0_1 = arith.constant 0 : index
    %0 = vector.load %arg1[%c0, %c0_0, %c0_1] : memref<1x4x256xf32, #tpu.memory_space<vmem>>, vector<1x4x256xf32>
    %1 = math.exp %0 : vector<1x4x256xf32>
    %cst = arith.constant dense<0.000000e+00> : vector<1x256xf32>
    %2 = vector.multi_reduction <add>, %1, %cst [1] : vector<1x4x256xf32> to vector<1x256xf32>
    %3 = vector.shape_cast %2 : vector<1x256xf32> to vector<1x1x256xf32>
    %4 = vector.broadcast %3 : vector<1x1x256xf32> to vector<1x4x256xf32>
    %5 = arith.mulf %0, %4 : vector<1x4x256xf32>
    %c0_2 = arith.constant 0 : index
    %c0_3 = arith.constant 0 : index
    %6 = vector.load %arg2[%c0_2, %c0_3] : memref<256x81xf32, #tpu.memory_space<vmem>>, vector<256x81xf32>
    %7 = vector.shape_cast %5 : vector<1x4x256xf32> to vector<4x256xf32>
    %cst_4 = arith.constant dense<0.000000e+00> : vector<4x81xf32>
    %8 = tpu.matmul %7, %6, %cst_4 {dimension_numbers = #tpu.dot_dimension_numbers<[1], [0], [0], [1], [0, 0, 1, 1], [], []>} : vector<4x256xf32>, vector<256x81xf32>, vector<4x81xf32> -> vector<4x81xf32>
    %9 = vector.shape_cast %3 : vector<1x1x256xf32> to vector<1x256xf32>
    %cst_5 = arith.constant dense<0.000000e+00> : vector<1x81xf32>
    %10 = tpu.matmul %9, %6, %cst_5 {dimension_numbers = #tpu.dot_dimension_numbers<[1], [0], [0], [1], [0, 0, 1, 1], [], []>} : vector<1x256xf32>, vector<256x81xf32>, vector<1x81xf32> -> vector<1x81xf32>
    %11 = tpu.reciprocal %10 {approx = true} : vector<1x81xf32> -> vector<1x81xf32>
    %12 = arith.mulf %10, %11 : vector<1x81xf32>
    %cst_6 = arith.constant 2.000000e+00 : f32
    %13 = vector.broadcast %cst_6 : f32 to vector<1x81xf32>
    %14 = arith.subf %13, %12 : vector<1x81xf32>
    %15 = arith.mulf %11, %14 : vector<1x81xf32>
    %16 = vector.broadcast %15 : vector<1x81xf32> to vector<4x81xf32>
    %17 = arith.mulf %8, %16 : vector<4x81xf32>
    %c0_7 = arith.constant 0 : index
    %c0_8 = arith.constant 0 : index
    %c0_9 = arith.constant 0 : index
    %18 = vector.load %arg3[%c0_7, %c0_8, %c0_9] : memref<1x4x81xf32, #tpu.memory_space<vmem>>, vector<1x4x81xf32>
    %19 = vector.shape_cast %18 : vector<1x4x81xf32> to vector<4x81xf32>
    %20 = vector.shape_cast %17 : vector<4x81xf32> to vector<1x4x81xf32>
    tpu.vector_store %arg3[%c0_7, %c0_8, %c0_9], %20 {strides = array<i32>} : memref<1x4x81xf32, #tpu.memory_space<vmem>>, vector<1x4x81xf32>,
    return
  }
  func.func @transform_0(%arg0: i32) -> (i32, i32, i32) {
    %c0_i32 = arith.constant 0 : i32
    %c0_i32_0 = arith.constant 0 : i32
    %c0_i32_1 = arith.constant 0 : i32
    return %arg0, %c0_i32, %c0_i32_0 : i32, i32, i32
  }
  func.func @transform_1(%arg0: i32) -> (i32, i32) {
    %c0_i32 = arith.constant 0 : i32
    %c0_i32_0 = arith.constant 0 : i32
    %c0_i32_1 = arith.constant 0 : i32
    return %c0_i32, %c0_i32_0 : i32, i32
  }
  func.func @transform_2(%arg0: i32) -> (i32, i32, i32) {
    %c0_i32 = arith.constant 0 : i32
    %c0_i32_0 = arith.constant 0 : i32
    %c0_i32_1 = arith.constant 0 : i32
    return %arg0, %c0_i32, %c0_i32_0 : i32, i32, i32
  }
}

</mosaic_0001>

<bundles_post_ra>
// kernel: tpu_custom_call.1
= control target key start
LH: loop header
LB: loop body
LE: loop exit
PB: predicated region body
PF: predicated region fallthrough
CT: control target
= control target key end

     0   :  { %7 = vsyncpa [#allocation3], 0  ;;  %s819_s0 = inlined_call_operand.vmem [shape: f32[2,4,256], index: 0, kind: input, shape index: {}]   ;;  %s820_s1 = inlined_call_operand.vmem [shape: f32[256,81], index: 1, kind: input, shape index: {}]   ;;  %s821_s2 = inlined_call_operand.hbm [shape: f32[2,4,81], index: 2, kind: output, shape index: {}]  }
   0x1   :  { %9 = vsyncpa [#allocation3 + $0x1], 0  ;;  %s630_s9 = smov 0   ;;  %s632_s10 = smov 0  }
   0x2   :  { %s634_s11 = smov 0   ;;  %s636_s12 = smov 0  }
   0x3 LB: > { %s651_s13 = sadd.s32 4294967295, %s612_s12   ;;  %s427_s14 = sadd.s32 4294967294, %s612_s12   ;;  %s612_s12 = sphi %s636_s12, %s827_s12   ;;  %s608_s11 = sphi %s634_s11, %s826_s11   ;;  %s604_s10 = sphi %s632_s10, %s825_s10   ;;  %s600_s9 = sphi %s630_s9, %s824_s9  }
   0x4   : > { %s655_s15 = sadd.s32 1, %s612_s12   ;;  %s69_s16 = sadd.s32 1, %s608_s11 }
   0x5   : > { %s66_s17 = ssub.s32 %s612_s12, %s655_s15  ;;  %p79_p0 = scmp.ne.s32.totalorder %s608_s11, %s604_s10 }
   0x6   : > { %p67_p1 = scmp.eq.s32.totalorder %s66_s17, 0  ;;  %p80_p2 = scmp.eq.s32.totalorder %s651_s13, 1 }
   0x7   : > { %p85_p3 = scmp.ne.s32.totalorder %s604_s10, %s600_s9  ;;  %p86_p4 = scmp.eq.s32.totalorder %s427_s14, 1 }
   0x8   : > { %s666_s18 = scalar_select %p67_p1, %s608_s11, %s69_s16  }
   0x9   : > { %p668_p5 = por %p80_p2, %p79_p0  ;;  %p672_p6 = por %p86_p4, %p85_p3 }
   0xa   : > { %p430_p7 = scmp.ge.s32.totalorder %s612_s12, 1  ;;  %p115_p8 = scmp.lt.s32.totalorder %s612_s12, 3 }
   0xc   : > { %p116_p9 = pnand %p430_p7, %p115_p8 }
   0xd   : > { %p137_p10 = scmp.lt.s32.totalorder (!%p116_p9), %s651_s13, 1  ;;  %s134_s5 = sand.u32 (!%p116_p9), 1, %s604_s10  }
   0xe   : > { %119 = sbr.rel (%p116_p9) target bundleno = 290 (0x122), region = 28  ;;  %s431_s6 = sshll.u32 (!%p116_p9), %s134_s5, 2 }
   0xf   : > { %s435_s7 = sshll.u32 (!%p116_p9), %s651_s13, 6  ;;  %s355_s22 = scalar_lea.sflag (!%p116_p9), [#allocation3], %s134_s5 }
  0x10   : > { %s366_s21 = scalar_lea.hbm (!%p116_p9), %s821_s2, %s435_s7  ;;  %s614_s24 = smov (!%p116_p9), [#allocation2]  }
  0x13   : > { %v199_v0 = vld [vmem:[%s820_s1 + $0xf8] sm:$0xff]  ;;  %v198_v2 = vld [vmem:[%s820_s1 + $0xf0] sm:$0xff]  ;;  %v197_v4 = vld [vmem:[%s820_s1 + $0xe8] sm:$0xff]  ;;  %s138_s3 = scalar_select %p137_p10, %s651_s13, 1  ;;  %vm148_vm0 = vcmask 1043456   ;;  %v347_v56 = vlaneseq  ;;  %vm352_vm1 = vcmask 658432  }
  0x14   : > { %v183_v1 = vld [vmem:[%s820_s1 + $0x78] sm:$0xff]  ;;  %474 = vmatprep.subr.mxu1 %v199_v0  ;;  %v182_v3 = vld [vmem:[%s820_s1 + $0x70] sm:$0xff]  ;;  %439 = vmatprep.subr.mxu0 %v199_v0  ;;  %v181_v5 = vld [vmem:[%s820_s1 + $0x68] sm:$0xff]  ;;  %s556_s13 = sshll.u32 %s614_s24, 4  ;;  %s557_s13 = int_to_ptr.vmem [resolvable:$false] %s556_s13 }
  0x15   : > { %475 = vmatpush3.msra.mxu1 %v183_v1  ;;  %440 = vmatpush3.msra.mxu0 %v183_v1  ;;  %v196_v6 = vld [vmem:[%s820_s1 + $0xe0] sm:$0xff]  ;;  %s438_s8 = sshll.u32 %s138_s3, 3  ;;  %v195_v8 = vld [vmem:[%s820_s1 + $0xd8] sm:$0xff]  ;;  %v194_v10 = vld [vmem:[%s820_s1 + $0xd0] sm:$0xff]  ;;  %v348_v57 = vshrl.u32 %v347_v56, 7  ;;  %s558_s25 = scalar_lea.vmem %s557_s13, 128 }
  0x16   : > { %476 = vmatprep.subr.mxu1 %v198_v2  ;;  %441 = vmatprep.subr.mxu0 %v198_v2  ;;  %v180_v7 = vld [vmem:[%s820_s1 + $0x60] sm:$0xff]  ;;  %v179_v9 = vld [vmem:[%s820_s1 + $0x58] sm:$0xff]  ;;  %s141_s26 = scalar_lea.vmem %s819_s0, %s438_s8  ;;  %v178_v11 = vld [vmem:[%s820_s1 + $0x50] sm:$0xff]  ;;  %s136_s8 = scalar_lea.vmem [#allocation2], %s431_s6 }
  0x17   : > { %477 = vmatpush3.msra.mxu1 %v182_v3  ;;  %442 = vmatpush3.msra.mxu0 %v182_v3  ;;  %v193_v12 = vld [vmem:[%s820_s1 + $0xc8] sm:$0xff]  ;;  %v722_v13 = vld [vmem:[%s141_s26] sm:$0xff]  ;;  %v191_v18 = vld [vmem:[%s820_s1 + $0xb8] sm:$0xff]  ;;  %v349_v62 = vsub.s32 0, %v348_v57  ;;  %s368_s14 = sshll.u32 %s136_s8, 4  ;;  %s369_s14 = int_to_ptr.vmem [resolvable:$true] %s368_s14 }
  0x18   : > { %478 = vmatprep.subr.mxu1 %v197_v4  ;;  %443 = vmatprep.subr.mxu0 %v197_v4  ;;  %v177_v14 = vld [vmem:[%s820_s1 + $0x48] sm:$0xff]  ;;  %v143_v15 = vmul.f32 1.442695, %v722_v13  ;;  %v192_v16 = vld [vmem:[%s820_s1 + $0xc0] sm:$0xff]  ;;  %v175_v19 = vld [vmem:[%s820_s1 + $0x38] sm:$0xff]  ;;  %s552_s23 = scalar_lea.vmem %s369_s14, 64  ;;  %p559_p0 = scmp.lt.s32.totalorder %s369_s14, %s557_s13 }
  0x19   : > { %479 = vmatpush3.msra.mxu1 %v181_v5  ;;  %444 = vmatpush3.msra.mxu0 %v181_v5  ;;  %v176_v17 = vld [vmem:[%s820_s1 + $0x40] sm:$0xff]  ;;  %v190_v20 = vld [vmem:[%s820_s1 + $0xb0] sm:$0xff]  ;;  %v189_v22 = vld [vmem:[%s820_s1 + $0xa8] sm:$0xff]  ;;  %p553_p11 = scmp.ne.s32.totalorder %s369_s14, %s552_s23  ;;  %p560_p1 = scmp.lt.s32.totalorder %s558_s25, %s552_s23 }
  0x1a   : > { %480 = vmatprep.subr.mxu1 %v196_v6  ;;  %445 = vmatprep.subr.mxu0 %v196_v6  ;;  %548 = vpow2.f32 %v143_v15  ;;  %v174_v21 = vld [vmem:[%s820_s1 + $0x30] sm:$0xff]  ;;  %v173_v23 = vld [vmem:[%s820_s1 + $0x28] sm:$0xff]  ;;  %v188_v24 = vld [vmem:[%s820_s1 + $0xa0] sm:$0xff] }
  0x1b   : > { %481 = vmatpush3.msra.mxu1 %v180_v7  ;;  %446 = vmatpush3.msra.mxu0 %v180_v7  ;;  %v172_v25 = vld [vmem:[%s820_s1 + $0x20] sm:$0xff]  ;;  %v187_v26 = vld [vmem:[%s820_s1 + $0x98] sm:$0xff]  ;;  %v186_v28 = vld [vmem:[%s820_s1 + $0x90] sm:$0xff]  ;;  %p554_p12 = pnand %p553_p11, %p668_p5  ;;  %p561_p2 = por %p560_p1, %p559_p0 }
  0x1c   : > { %482 = vmatprep.subr.mxu1 %v195_v8  ;;  %447 = vmatprep.subr.mxu0 %v195_v8  ;;  %v171_v27 = vld [vmem:[%s820_s1 + $0x18] sm:$0xff]  ;;  %v170_v29 = vld [vmem:[%s820_s1 + $0x10] sm:$0xff]  ;;  %v185_v31 = vld [vmem:[%s820_s1 + $0x88] sm:$0xff] }
  0x1d   : > { %483 = vmatpush3.msra.mxu1 %v179_v9  ;;  %448 = vmatpush3.msra.mxu0 %v179_v9  ;;  %v169_v32 = vld [vmem:[%s820_s1 + $0x8] sm:$0xff]  ;;  %v184_v35 = vld [vmem:[%s820_s1 + $0x80] sm:$0xff]  ;;  %p555_p13 = pneg %p554_p12 }
  0x1e   : > { %484 = vmatprep.subr.mxu1 %v194_v10  ;;  %449 = vmatprep.subr.mxu0 %v194_v10  ;;  %v168_v37 = vld [vmem:[%s820_s1] sm:$0xff] }
  0x1f   : > { %485 = vmatpush3.msra.mxu1 %v178_v11  ;;  %450 = vmatpush3.msra.mxu0 %v178_v11  ;;  %p562_p3 = pnand %p561_p2, %p555_p13 }
  0x20   : > { %486 = vmatprep.subr.mxu1 %v193_v12  ;;  %451 = vmatprep.subr.mxu0 %v193_v12 }
  0x21   : > { %487 = vmatpush3.msra.mxu1 %v177_v14  ;;  %452 = vmatpush3.msra.mxu0 %v177_v14 }
  0x22   : > { %488 = vmatprep.subr.mxu1 %v192_v16  ;;  %453 = vmatprep.subr.mxu0 %v192_v16 }
  0x23   : > { %489 = vmatpush3.msra.mxu1 %v176_v17  ;;  %454 = vmatpush3.msra.mxu0 %v176_v17 }
  0x24   : > { %490 = vmatprep.subr.mxu1 %v191_v18  ;;  %455 = vmatprep.subr.mxu0 %v191_v18 }
  0x25   : > { %491 = vmatpush3.msra.mxu1 %v175_v19  ;;  %456 = vmatpush3.msra.mxu0 %v175_v19 }
  0x26   : > { %492 = vmatprep.subr.mxu1 %v190_v20  ;;  %457 = vmatprep.subr.mxu0 %v190_v20 }
  0x27   : > { %493 = vmatpush3.msra.mxu1 %v174_v21  ;;  %458 = vmatpush3.msra.mxu0 %v174_v21  ;;  %v549_v30 = vpop.eup %548 }
  0x28   : > { %494 = vmatprep.subr.mxu1 %v189_v22  ;;  %459 = vmatprep.subr.mxu0 %v189_v22  ;;  %v146_v33 = vcombine.high %v549_v30, %v549_v30  ;;  %v149_v34 = vsel %vm148_vm0, %v549_v30, 0.0 }
  0x29   : > { %495 = vmatpush3.msra.mxu1 %v173_v23  ;;  %460 = vmatpush3.msra.mxu0 %v173_v23  ;;  %v150_v36 = vrot.slane %v149_v34, 4 }
  0x2a   : > { %496 = vmatprep.subr.mxu1 %v188_v24  ;;  %461 = vmatprep.subr.mxu0 %v188_v24  ;;  %v156_v38 = vsel %vm148_vm0, %v146_v33, 0.0 }
  0x2b   : > { %497 = vmatpush3.msra.mxu1 %v172_v25  ;;  %462 = vmatpush3.msra.mxu0 %v172_v25  ;;  %v151_v39 = vadd.f32 %v150_v36, %v149_v34  ;;  %v157_v40 = vrot.slane %v156_v38, 4 }
  0x2c   : > { %498 = vmatprep.subr.mxu1 %v187_v26  ;;  %463 = vmatprep.subr.mxu0 %v187_v26 }
  0x2d   : > { %499 = vmatpush3.msra.mxu1 %v171_v27  ;;  %464 = vmatpush3.msra.mxu0 %v171_v27  ;;  %v152_v41 = vrot.slane %v151_v39, 2  ;;  %v158_v42 = vadd.f32 %v157_v40, %v156_v38 }
  0x2e   : > { %500 = vmatprep.subr.mxu1 %v186_v28  ;;  %465 = vmatprep.subr.mxu0 %v186_v28 }
  0x2f   : > { %501 = vmatpush3.msra.mxu1 %v170_v29  ;;  %466 = vmatpush3.msra.mxu0 %v170_v29  ;;  %v153_v43 = vadd.f32 %v152_v41, %v151_v39  ;;  %v159_v44 = vrot.slane %v158_v42, 2 }
  0x30   : > { %502 = vmatprep.subr.mxu1 %v185_v31  ;;  %467 = vmatprep.subr.mxu0 %v185_v31 }
  0x31   : > { %503 = vmatpush3.msra.mxu1 %v169_v32  ;;  %468 = vmatpush3.msra.mxu0 %v169_v32  ;;  %v154_v45 = vrot.slane %v153_v43, 1  ;;  %v160_v46 = vadd.f32 %v159_v44, %v158_v42 }
  0x32   : > { %504 = vmatprep.subr.mxu1 %v184_v35  ;;  %469 = vmatprep.subr.mxu0 %v184_v35 }
  0x33   : > { %505 = vmatpush3.msra.mxu1 %v168_v37  ;;  %470 = vmatpush3.msra.mxu0 %v168_v37  ;;  %v161_v47 = vrot.slane %v160_v46, 1  ;;  %v155_v48 = vadd.f32 %v154_v45, %v153_v43 }
  0x35   : > { %v162_v49 = vadd.f32 %v161_v47, %v160_v46 }
  0x37   : > { %v165_v50 = vcombine.low %v155_v48, %v162_v49  ;;  %337 = vmatprep.mubr.f32.mxu1 %v162_v49 }
  0x38   : > { %338 = vmatmul.mubr.f32.vlgmr.msra.gmra.mxu1 %v155_v48 }
  0x39   : > { %v167_v51 = vmul.f32 %v165_v50, %v722_v13 }
  0x3b   : > { %v201_v52 = vcombine.high %v167_v51, %v167_v51 }
  0x3d   : > { %267 = vmatprep.mubr.f32.mxu0 %v201_v52 }
  0x3e   : > { %268 = vmatmul.mubr.f32.vlgmr.msra.gmra.mxu0 %v167_v51 }
  0xf8   : > { %v506_v53 = vpop.f32.mrf.mxu1 }
  0xfa   : > { %v507_v54 = vpop.f32.mrf.mxu1 }
  0xfb   : > { %v508_v55 = vadd.f32 %v507_v54, %v506_v53 }
  0xfd   : > { %550 = vrcp.f32 %v508_v55 }
  0xfe   : > { %v471_v59 = vpop.f32.mrf.mxu0 }
 0x100   : > { %v472_v63 = vpop.f32.mrf.mxu0 }
 0x101   : > { %v473_v1 = vadd.f32 %v472_v63, %v471_v59 }
 0x10a   : > { %v551_v58 = vpop.eup %550 }
 0x10b   : > { %v344_v60 = vmul.f32 %v551_v58, %v508_v55 }
 0x10d   : > { %v345_v61 = vsub.f32 2.0, %v344_v60 }
 0x10f   : > { %v346_v0 = vmul.f32 %v551_v58, %v345_v61 }
 0x111   : > { %v350_v2 = vrot.slane %v346_v0, %v349_v62 }
 0x113   : > { %v351_v3 = vmul.f32 %v473_v1, %v350_v2 }
 0x115   : > { %353 = vst.msk [vmem:[%s136_s8] sm:$0xf] %vm352_vm1, %v351_v3 }
 0x116   : > { %565 = shalt.err (!%p562_p3)
}
 0x117   : > { %s566_s26 = scalar_lea.hbm %s366_s21, 64  ;;  %s570_s29 = scalar_lea.hbm %s821_s2, 128 }
 0x118   : > { %p567_p4 = scmp.ne.s32.totalorder %s366_s21, %s566_s26  ;;  %p571_p9 = scmp.lt.s32.totalorder %s366_s21, %s821_s2 }
 0x119   : > { %p572_p10 = scmp.lt.s32.totalorder %s570_s29, %s566_s26 }
 0x11a   : > { %p568_p7 = pnand %p567_p4, %p668_p5 }
 0x11b   : > { %p573_p11 = por %p572_p10, %p571_p9 }
 0x11c   : > { %p569_p8 = pneg %p568_p7 }
 0x11e   : > { %p574_p12 = pnand %p573_p11, %p569_p8 }
 0x120   : > { %577 = shalt.err (!%p574_p12)
}
 0x121   : > { %509 = dma.vmem_to_hbm [thread:$0]  (%p668_p5), %s369_s14, 64, %s366_s21, %s355_s22  }
 0x122 PF: > { %p515_p13 = scmp.ge.s32.totalorder %s612_s12, 2  ;;  %s380_s4 = sand.u32 1, %s600_s9  }
 0x123   : > { %s381_s5 = scalar_lea.sflag [#allocation3], %s380_s4 }
 0x124   : > { %p512_p0 = pnand %p515_p13, %p672_p6 }
 0x126   : > { %p513_p1 = pneg %p512_p0 }
 0x128   : > { %595 = dma.done.wait (%p513_p1), %s381_s5, 64  }
 0x129   : > { %597 = vsyncadd (%p513_p1), %s381_s5, 4294967232  ;;  %p12_p2 = scmp.ge.s32.totalorder %s655_s15, 4   ;;  %s824_s9 = smov %s604_s10 }
 0x12a   : > { %s825_s10 = smov %s608_s11  ;;  %s826_s11 = smov %s666_s18 }
 0x12b   : > { %s827_s12 = smov %s655_s15  ;;  %14 = sbr.rel (!%p12_p2) target bundleno = 3 (0x3), region = 63 }
 0x130   :  { %386 = vsyncpa [#allocation3], 1 }
 0x131   :  { %388 = vsyncpa [#allocation3 + $0x1], 1 }

</bundles_post_ra>
